<compile_context>
chip_gen: v6e
topology: v6e:2x2x1
jax: 0.10.0
libtpu: 0.0.40
codegen_flags: <defaults>
</compile_context>

<pallas_src>
import functools

import numpy as np
import jax
import jax.numpy as jnp
from jax.experimental import pallas as pl
from jax.experimental.pallas import tpu as pltpu

_BN_EPS = 1e-5
_VMEM_CAP = 48 * 1024 * 1024     # leave headroom on v7x's 64 MiB physical VMEM
_VMEM_MIN = 8 * 1024 * 1024


def _round_up(x, m):
    return (x + m - 1) // m * m


def _cdiv(a, b):
    return -(-a // b)


def _pad2(a, r, c):
    if a.shape == (r, c):
        return a
    return jnp.pad(a, ((0, r - a.shape[0]), (0, c - a.shape[1])))


def _pad1(v, n):
    v = v.astype(jnp.float32)
    if v.shape[0] == n:
        return v
    return jnp.pad(v, (0, n - v.shape[0]))


def _vmem_bytes(foot):
    # footprint + 50% headroom for Mosaic's own scratch, capped for v7x.
    return int(min(max(foot * 3 // 2, _VMEM_MIN), _VMEM_CAP))


def _tile_plan(M, K, Cout):
    """Choose M/K tiling.

    M rows are split into ~512-row sublane-aligned tiles (>=2 tiles on medium
    shapes so the 'parallel' axis can feed both v7x TensorCores).  K tiles are
    128-aligned and chosen to minimize zero padding with a ~512 target.
    """
    num_m = max(1, _cdiv(M, 512))
    if num_m == 1 and M > 256:
        num_m = 2
    tm = _round_up(_cdiv(M, num_m), 8)
    Mp = tm * num_m

    Kp0 = _round_up(K, 128)
    if Kp0 <= 768:
        tk, Kp = Kp0, Kp0                       # single K step
    else:
        best = None
        for nk in range(max(1, Kp0 // 768), Kp0 // 256 + 2):
            tk_c = _round_up(_cdiv(Kp0, nk), 128)
            kp_c = tk_c * nk
            key = (kp_c - Kp0, abs(tk_c - 512))  # minimize padding, then ~512
            if best is None or key < best[0]:
                best = (key, tk_c, kp_c)
        tk, Kp = best[1], best[2]

    Cp = _round_up(Cout, 128)
    return Mp, Kp, Cp, tm, tk, num_m


# ---------------------------------------------------------------------------
# Phase 1: tiled matmul (bf16 MXU inputs, f32 accumulation) that also emits
# per-M-tile BN partial statistics (sum, sum of squares) per channel.
# Grid = (M tiles, K tiles); K is the reduction ("arbitrary") axis.
# Output y is stored in bf16; stats come from the f32 accumulator.
# ---------------------------------------------------------------------------
def _matmul_stats_kernel(a_ref, w_ref, y_ref, stats_ref, acc_ref):
    k = pl.program_id(1)

    @pl.when(k == 0)
    def _():
        acc_ref[...] = jnp.zeros_like(acc_ref)

    acc_ref[...] += jnp.dot(a_ref[...], w_ref[...],
                            preferred_element_type=jnp.float32)

    @pl.when(k == pl.num_programs(1) - 1)
    def _():
        acc = acc_ref[...]
        y_ref[...] = acc.astype(y_ref.dtype)
        # Padded (zero) rows / K columns contribute 0 to both partial sums.
        stats_ref[0, 0:1, :] = jnp.sum(acc, axis=0, keepdims=True)
        stats_ref[0, 1:2, :] = jnp.sum(acc * acc, axis=0, keepdims=True)


@functools.lru_cache(maxsize=None)
def _get_matmul_stats_fn(Mp, Kp, Cp, tm, tk):
    num_m, num_k = Mp // tm, Kp // tk
    foot = (2 * tm * tk * 2          # A blocks, bf16, double-buffered
            + 2 * tk * Cp * 2        # W blocks, bf16, double-buffered
            + tm * Cp * 4            # f32 accumulator scratch
            + 2 * tm * Cp * 2        # y output blocks, bf16, double-buffered
            + 2 * 2 * Cp * 4)        # stats output blocks
    fn = pl.pallas_call(
        _matmul_stats_kernel,
        out_shape=(jax.ShapeDtypeStruct((Mp, Cp), jnp.bfloat16),
                   jax.ShapeDtypeStruct((num_m, 2, Cp), jnp.float32)),
        grid_spec=pltpu.PrefetchScalarGridSpec(
            num_scalar_prefetch=0,
            grid=(num_m, num_k),
            in_specs=[
                pl.BlockSpec((tm, tk), lambda i, k: (i, k)),   # patches
                pl.BlockSpec((tk, Cp), lambda i, k: (k, 0)),   # weights
            ],
            out_specs=(
                pl.BlockSpec((tm, Cp), lambda i, k: (i, 0)),       # conv out
                pl.BlockSpec((1, 2, Cp), lambda i, k: (i, 0, 0)),  # stats
            ),
            scratch_shapes=[pltpu.VMEM((tm, Cp), jnp.float32)],
        ),
        compiler_params=pltpu.CompilerParams(
            dimension_semantics=("parallel", "arbitrary"),
            vmem_limit_bytes=_vmem_bytes(foot)),
    )
    return jax.jit(fn)


# ---------------------------------------------------------------------------
# Phase 2: streamed normalize  out = y*scale + shift (+residual) (+ReLU),
# with precomputed per-channel scale/shift (f32).  Inputs/outputs are bf16.
# ---------------------------------------------------------------------------
def _bn_apply_kernel(y_ref, sc_ref, sh_ref, *rest, relu, has_res):
    if has_res:
        res_ref, out_ref = rest
    else:
        (out_ref,) = rest
    out = y_ref[...].astype(jnp.float32) * sc_ref[...] + sh_ref[...]
    if has_res:
        out = out + res_ref[...].astype(jnp.float32)
    if relu:
        out = jnp.maximum(out, 0.0)
    out_ref[...] = out.astype(out_ref.dtype)


@functools.lru_cache(maxsize=None)
def _get_bn_apply_fn(Mp, Cp, tm, num_m, relu, has_res):
    kernel = functools.partial(_bn_apply_kernel, relu=relu, has_res=has_res)
    in_specs = [
        pl.BlockSpec((tm, Cp), lambda i: (i, 0)),   # y (bf16)
        pl.BlockSpec((1, Cp), lambda i: (0, 0)),    # scale (f32, resident)
        pl.BlockSpec((1, Cp), lambda i: (0, 0)),    # shift (f32, resident)
    ]
    if has_res:
        in_specs.append(pl.BlockSpec((tm, Cp), lambda i: (i, 0)))  # residual
    n_stream = 2 + (1 if has_res else 0)            # y, out, (residual)
    foot = n_stream * 2 * tm * Cp * 2 + 2 * 2 * Cp * 4
    fn = pl.pallas_call(
        kernel,
        out_shape=jax.ShapeDtypeStruct((Mp, Cp), jnp.bfloat16),
        grid_spec=pltpu.PrefetchScalarGridSpec(
            num_scalar_prefetch=0,
            grid=(num_m,),
            in_specs=in_specs,
            out_specs=pl.BlockSpec((tm, Cp), lambda i: (i, 0)),
        ),
        compiler_params=pltpu.CompilerParams(
            dimension_semantics=("parallel",),
            vmem_limit_bytes=_vmem_bytes(foot)),
    )
    return jax.jit(fn)


def _conv_matmul_bn(a_bf16, w, gamma, beta, res, relu):
    M, K = a_bf16.shape
    Cout = w.shape[1]
    Mp, Kp, Cp, tm, tk, num_m = _tile_plan(M, K, Cout)

    a_p = _pad2(a_bf16, Mp, Kp)
    w_p = _pad2(w.astype(jnp.bfloat16), Kp, Cp)

    y, stats = _get_matmul_stats_fn(Mp, Kp, Cp, tm, tk)(a_p, w_p)

    # Finalize BN scale/shift once in plain JAX (tiny reduction), so phase 2
    # is a pure streamed normalize.  Padded rows/columns are exact zeros in
    # the f32 accumulator and so do not perturb the sums; divide by true M.
    tot = jnp.sum(stats, axis=0)                 # (2, Cp), f32
    inv_m = 1.0 / float(M)
    mean = tot[0] * inv_m
    # TODO(synk): single-pass E[y^2]-mean^2 variance; switch to a centered /
    # two-pass formulation if post-conv magnitudes ever get large enough for
    # catastrophic cancellation in f32.
    var = jnp.maximum(tot[1] * inv_m - mean * mean, 0.0)
    scale = _pad1(gamma, Cp) * jax.lax.rsqrt(var + _BN_EPS)
    shift = _pad1(beta, Cp) - mean * scale

    args = [y, scale.reshape(1, Cp), shift.reshape(1, Cp)]
    has_res = res is not None
    if has_res:
        args.append(_pad2(res, Mp, Cp))

    out = _get_bn_apply_fn(Mp, Cp, tm, num_m, bool(relu), has_res)(*args)
    if (Mp, Cp) != (M, Cout):
        out = out[:M, :Cout]
    return out


# ---------------------------------------------------------------------------
# im2col glue (plain JAX, bf16) + conv wrapper.
# ---------------------------------------------------------------------------
def _extract_patches(x, kh, kw, stride, pad):
    N, H, W, C = x.shape
    Ho = (H + 2 * pad - kh) // stride + 1
    Wo = (W + 2 * pad - kw) // stride + 1
    if kh == 1 and kw == 1:
        if stride != 1:
            x = x[:, ::stride, ::stride, :]
        return x.reshape(N * Ho * Wo, C), Ho, Wo
    xp = jnp.pad(x, ((0, 0), (pad, pad), (pad, pad), (0, 0)))
    cols = [xp[:, i:i + stride * Ho:stride, j:j + stride * Wo:stride, :]
            for i in range(kh) for j in range(kw)]
    patches = jnp.concatenate(cols, axis=-1)          # (N, Ho, Wo, kh*kw*C)
    return patches.reshape(N * Ho * Wo, kh * kw * C), Ho, Wo


def conv_bn_act(x, w, gamma, beta, *, stride, pad, relu, residual=None):
    KH, KW, Cin, Cout = w.shape
    N = x.shape[0]
    patches, Ho, Wo = _extract_patches(x.astype(jnp.bfloat16),
                                       KH, KW, stride, pad)
    res = (residual.reshape(N * Ho * Wo, Cout).astype(jnp.bfloat16)
           if residual is not None else None)
    out = _conv_matmul_bn(patches, w.reshape(KH * KW * Cin, Cout),
                          gamma, beta, res, relu)
    return out.reshape(N, Ho, Wo, Cout)


# ---------------------------------------------------------------------------
# MaxPool2d(kernel=3, stride=2, padding=1).
# W-direction window max: one fused XLA pass over the padded map.
# H-direction window max: one Pallas kernel, one image per grid step; a free
# out-of-kernel reshape turns input rows 2h/2h+1/2h+2 into [h,0],[h,1],[h+1,0]
# so the kernel needs only unit-stride static slices.
# TODO(synk): fold the W-direction max into the same kernel (needs in-kernel
# sublane-strided access or a lane-fold relayout).
# ---------------------------------------------------------------------------
def _maxpool_h_kernel(r_ref, o_ref):
    ho = o_ref.shape[0]
    a = r_ref[0:ho, 0]
    b = r_ref[0:ho, 1]
    c = r_ref[1:ho + 1, 0]
    o_ref[...] = jnp.maximum(jnp.maximum(a, b), c)


@functools.lru_cache(maxsize=None)
def _get_maxpool_fn(N, Ho, Wo, C, dtype):
    fn = pl.pallas_call(
        _maxpool_h_kernel,
        out_shape=jax.ShapeDtypeStruct((N * Ho, Wo, C), dtype),
        grid_spec=pltpu.PrefetchScalarGridSpec(
            num_scalar_prefetch=0,
            grid=(N,),
            in_specs=[pl.BlockSpec((Ho + 1, 2, Wo, C),
                                   lambda n: (n, 0, 0, 0))],
            out_specs=pl.BlockSpec((Ho, Wo, C), lambda n: (n, 0, 0)),
        ),
        compiler_params=pltpu.CompilerParams(
            dimension_semantics=("parallel",)),
    )
    return jax.jit(fn)


def maxpool_3x3_s2_p1(x):
    N, H, W, C = x.shape
    Ho = (H - 1) // 2 + 1
    Wo = (W - 1) // 2 + 1
    neg = jnp.finfo(x.dtype).min
    Hp, Wp = 2 * Ho + 2, 2 * Wo + 2
    xp = jnp.pad(x, ((0, 0), (1, Hp - H - 1), (1, Wp - W - 1), (0, 0)),
                 constant_values=neg)
    # W-direction max of the 3-wide, stride-2 window (fused by XLA).
    wm = jnp.maximum(
        jnp.maximum(xp[:, :, 0:2 * Wo:2, :], xp[:, :, 1:2 * Wo + 1:2, :]),
        xp[:, :, 2:2 * Wo + 2:2, :])                  # (N, Hp, Wo, C)
    wr = wm.reshape(N * (Ho + 1), 2, Wo, C)           # free reshape
    out = _get_maxpool_fn(N, Ho, Wo, C, x.dtype)(wr)
    return out.reshape(N, Ho, Wo, C)


# ---------------------------------------------------------------------------
# AdaptiveAvgPool2d((1,1)) + flatten — spatial mean per image, f32 output.
# ---------------------------------------------------------------------------
def _avgpool_kernel(x_ref, o_ref):
    o_ref[0] = jnp.mean(x_ref[0].astype(jnp.float32), axis=0, keepdims=True)


@functools.lru_cache(maxsize=None)
def _get_avgpool_fn(N, HW, C):
    fn = pl.pallas_call(
        _avgpool_kernel,
        out_shape=jax.ShapeDtypeStruct((N, 1, C), jnp.float32),
        grid_spec=pltpu.PrefetchScalarGridSpec(
            num_scalar_prefetch=0,
            grid=(N,),
            in_specs=[pl.BlockSpec((1, HW, C), lambda n: (n, 0, 0))],
            out_specs=pl.BlockSpec((1, 1, C), lambda n: (n, 0, 0)),
        ),
        compiler_params=pltpu.CompilerParams(
            dimension_semantics=("parallel",)),
    )
    return jax.jit(fn)


def global_avgpool(x):
    N, H, W, C = x.shape
    xr = x.reshape(N, H * W, C)
    out = _get_avgpool_fn(N, H * W, C)(xr)
    return out.reshape(N, C)


# ---------------------------------------------------------------------------
# ResNet-50 parameters (deterministic synthetic init) and forward pass
# ---------------------------------------------------------------------------
def init_resnet50_params(key):
    keys = iter(jax.random.split(key, 512))

    def conv_w(kh, kw, cin, cout):
        return (jax.random.normal(next(keys), (kh, kw, cin, cout), jnp.float32)
                / np.sqrt(kh * kw * cin))

    def bn_params(c):
        g = 1.0 + 0.1 * jax.random.normal(next(keys), (c,), jnp.float32)
        b = 0.1 * jax.random.normal(next(keys), (c,), jnp.float32)
        return g, b

    params = {}
    params['conv1_w'] = conv_w(7, 7, 3, 64)
    params['bn1_g'], params['bn1_b'] = bn_params(64)

    cfg = [(64, 3, 1), (128, 4, 2), (256, 6, 2), (512, 3, 2)]
    expansion = 4
    in_ch = 64
    for li, (planes, n_blocks, stride) in enumerate(cfg, start=1):
        blocks = []
        for bi in range(n_blocks):
            s = stride if bi == 0 else 1
            blk = {'stride': s}
            blk['conv1_w'] = conv_w(1, 1, in_ch, planes)
            blk['bn1_g'], blk['bn1_b'] = bn_params(planes)
            blk['conv2_w'] = conv_w(3, 3, planes, planes)
            blk['bn2_g'], blk['bn2_b'] = bn_params(planes)
            blk['conv3_w'] = conv_w(1, 1, planes, planes * expansion)
            blk['bn3_g'], blk['bn3_b'] = bn_params(planes * expansion)
            if bi == 0 and (s != 1 or in_ch != planes * expansion):
                blk['ds_w'] = conv_w(1, 1, in_ch, planes * expansion)
                blk['ds_g'], blk['ds_b'] = bn_params(planes * expansion)
            blocks.append(blk)
            in_ch = planes * expansion
        params[f'layer{li}'] = blocks
    return params


def _bottleneck(x, p):
    s = p['stride']
    identity = x
    out = conv_bn_act(x, p['conv1_w'], p['bn1_g'], p['bn1_b'],
                      stride=1, pad=0, relu=True)
    out = conv_bn_act(out, p['conv2_w'], p['bn2_g'], p['bn2_b'],
                      stride=s, pad=1, relu=True)
    if 'ds_w' in p:
        identity = conv_bn_act(x, p['ds_w'], p['ds_g'], p['ds_b'],
                               stride=s, pad=0, relu=False)
    # out = relu(bn3(conv3(out)) + identity) — residual & ReLU fused into the
    # BN-apply kernel.
    out = conv_bn_act(out, p['conv3_w'], p['bn3_g'], p['bn3_b'],
                      stride=1, pad=0, relu=True, residual=identity)
    return out


def resnet_backbone_forward(x_nchw, params):
    # NCHW -> NHWC once; activations are carried in bf16 between kernels
    # (MXU accumulation, BN statistics and the BN epilogue stay f32).
    x = jnp.transpose(x_nchw, (0, 2, 3, 1)).astype(jnp.bfloat16)
    x = conv_bn_act(x, params['conv1_w'], params['bn1_g'], params['bn1_b'],
                    stride=2, pad=3, relu=True)
    x = maxpool_3x3_s2_p1(x)
    for name in ('layer1', 'layer2', 'layer3', 'layer4'):
        for blk in params[name]:
            x = _bottleneck(x, blk)
    feats = global_avgpool(x)        # adaptive avg pool to 1x1 + flatten
    return feats                     # (N, 2048) float32


if __name__ == "__main__":
    key = jax.random.PRNGKey(0)
    pkey, xkey = jax.random.split(key)
    params = init_resnet50_params(pkey)
    x = jax.random.normal(xkey, (2, 3, 16, 16), jnp.float32)  # NCHW, like PyTorch
    out = resnet_backbone_forward(x, params)
    out = jax.block_until_ready(out)
    assert out.shape == (2, 2048), out.shape
    assert bool(jnp.all(jnp.isfinite(out)))
    print("KERNEL_OK")
</pallas_src>

<mosaic_0001>
module attributes {stable_mosaic.version = 11 : i64} {
  func.func @_matmul_stats_kernel(%arg0: i32, %arg1: i32, %arg2: memref<128x256xbf16, #tpu.memory_space<vmem>>, %arg3: memref<256x128xbf16, #tpu.memory_space<vmem>>, %arg4: memref<128x128xbf16, #tpu.memory_space<vmem>>, %arg5: memref<1x2x128xf32, #tpu.memory_space<vmem>>, %arg6: memref<128x128xf32, #tpu.memory_space<vmem>>) attributes {dimension_semantics = [#tpu.dimension_semantics<parallel>, #tpu.dimension_semantics<arbitrary>], iteration_bounds = array<i64: 1, 1>, scalar_prefetch = 0 : i64, scratch_operands = 1 : i64, tpu.core_type = #tpu.core_type<tc>, window_params = [{transform_indices = @transform_0, window_bounds = array<i64: 128, 256>}, {transform_indices = @transform_1, window_bounds = array<i64: 256, 128>}, {transform_indices = @transform_2, window_bounds = array<i64: 128, 128>}, {transform_indices = @transform_3, window_bounds = array<i64: 1, 2, 128>}]} {
    %c0_i32 = arith.constant 0 : i32
    %0 = arith.cmpi eq, %arg1, %c0_i32 : i32
    %1 = arith.extui %0 : i1 to i32
    %c0_i32_0 = arith.constant 0 : i32
    %2 = arith.cmpi ne, %1, %c0_i32_0 : i32
    scf.if %2 {
      %cst_10 = arith.constant 0.000000e+00 : f32
      %12 = vector.broadcast %cst_10 : f32 to vector<128x128xf32>
      %c0_11 = arith.constant 0 : index
      %c0_12 = arith.constant 0 : index
      %13 = vector.load %arg6[%c0_11, %c0_12] : memref<128x128xf32, #tpu.memory_space<vmem>>, vector<128x128xf32>
      tpu.vector_store %arg6[%c0_11, %c0_12], %12 {strides = array<i32>} : memref<128x128xf32, #tpu.memory_space<vmem>>, vector<128x128xf32>,
    } else {
    }
    %c0 = arith.constant 0 : index
    %c0_1 = arith.constant 0 : index
    %3 = vector.load %arg6[%c0, %c0_1] : memref<128x128xf32, #tpu.memory_space<vmem>>, vector<128x128xf32>
    %c0_2 = arith.constant 0 : index
    %c0_3 = arith.constant 0 : index
    %4 = vector.load %arg2[%c0_2, %c0_3] : memref<128x256xbf16, #tpu.memory_space<vmem>>, vector<128x256xbf16>
    %c0_4 = arith.constant 0 : index
    %c0_5 = arith.constant 0 : index
    %5 = vector.load %arg3[%c0_4, %c0_5] : memref<256x128xbf16, #tpu.memory_space<vmem>>, vector<256x128xbf16>
    %cst = arith.constant dense<0.000000e+00> : vector<128x128xf32>
    %6 = tpu.matmul %4, %5, %cst {dimension_numbers = #tpu.dot_dimension_numbers<[1], [0], [0], [1], [0, 0, 1, 1], [], []>} : vector<128x256xbf16>, vector<256x128xbf16>, vector<128x128xf32> -> vector<128x128xf32>
    %7 = arith.addf %3, %6 : vector<128x128xf32>
    %c0_6 = arith.constant 0 : index
    %c0_7 = arith.constant 0 : index
    %8 = vector.load %arg6[%c0_6, %c0_7] : memref<128x128xf32, #tpu.memory_space<vmem>>, vector<128x128xf32>
    tpu.vector_store %arg6[%c0_6, %c0_7], %7 {strides = array<i32>} : memref<128x128xf32, #tpu.memory_space<vmem>>, vector<128x128xf32>,
    %c0_i32_8 = arith.constant 0 : i32
    %9 = arith.cmpi eq, %arg1, %c0_i32_8 : i32
    %10 = arith.extui %9 : i1 to i32
    %c0_i32_9 = arith.constant 0 : i32
    %11 = arith.cmpi ne, %10, %c0_i32_9 : i32
    scf.if %11 {
      %c0_10 = arith.constant 0 : index
      %c0_11 = arith.constant 0 : index
      %12 = vector.load %arg6[%c0_10, %c0_11] : memref<128x128xf32, #tpu.memory_space<vmem>>, vector<128x128xf32>
      %13 = arith.truncf %12 : vector<128x128xf32> to vector<128x128xbf16>
      %c0_12 = arith.constant 0 : index
      %c0_13 = arith.constant 0 : index
      %14 = vector.load %arg4[%c0_12, %c0_13] : memref<128x128xbf16, #tpu.memory_space<vmem>>, vector<128x128xbf16>
      tpu.vector_store %arg4[%c0_12, %c0_13], %13 {strides = array<i32>} : memref<128x128xbf16, #tpu.memory_space<vmem>>, vector<128x128xbf16>,
      %cst_14 = arith.constant dense<0.000000e+00> : vector<128xf32>
      %15 = vector.multi_reduction <add>, %12, %cst_14 [0] : vector<128x128xf32> to vector<128xf32>
      %16 = vector.shape_cast %15 : vector<128xf32> to vector<1x128xf32>
      %c0_15 = arith.constant 0 : index
      %c0_16 = arith.constant 0 : index
      %c0_17 = arith.constant 0 : index
      %17 = vector.load %arg5[%c0_15, %c0_16, %c0_17] : memref<1x2x128xf32, #tpu.memory_space<vmem>>, vector<1x1x128xf32>
      %18 = vector.shape_cast %17 : vector<1x1x128xf32> to vector<1x128xf32>
      %19 = vector.shape_cast %16 : vector<1x128xf32> to vector<1x1x128xf32>
      tpu.vector_store %arg5[%c0_15, %c0_16, %c0_17], %19 {strides = array<i32>} : memref<1x2x128xf32, #tpu.memory_space<vmem>>, vector<1x1x128xf32>,
      %20 = arith.mulf %12, %12 : vector<128x128xf32>
      %cst_18 = arith.constant dense<0.000000e+00> : vector<128xf32>
      %21 = vector.multi_reduction <add>, %20, %cst_18 [0] : vector<128x128xf32> to vector<128xf32>
      %22 = vector.shape_cast %21 : vector<128xf32> to vector<1x128xf32>
      %c0_19 = arith.constant 0 : index
      %c1 = arith.constant 1 : index
      %c0_20 = arith.constant 0 : index
      %23 = vector.load %arg5[%c0_19, %c1, %c0_20] : memref<1x2x128xf32, #tpu.memory_space<vmem>>, vector<1x1x128xf32>
      %24 = vector.shape_cast %23 : vector<1x1x128xf32> to vector<1x128xf32>
      %25 = vector.shape_cast %22 : vector<1x128xf32> to vector<1x1x128xf32>
      tpu.vector_store %arg5[%c0_19, %c1, %c0_20], %25 {strides = array<i32>} : memref<1x2x128xf32, #tpu.memory_space<vmem>>, vector<1x1x128xf32>,
    } else {
    }
    return
  }
  func.func @transform_0(%arg0: i32, %arg1: i32) -> (i32, i32) {
    %c0_i32 = arith.constant 0 : i32
    return %arg0, %arg1 : i32, i32
  }
  func.func @transform_1(%arg0: i32, %arg1: i32) -> (i32, i32) {
    %c0_i32 = arith.constant 0 : i32
    %c0_i32_0 = arith.constant 0 : i32
    return %arg1, %c0_i32 : i32, i32
  }
  func.func @transform_2(%arg0: i32, %arg1: i32) -> (i32, i32) {
    %c0_i32 = arith.constant 0 : i32
    %c0_i32_0 = arith.constant 0 : i32
    return %arg0, %c0_i32 : i32, i32
  }
  func.func @transform_3(%arg0: i32, %arg1: i32) -> (i32, i32, i32) {
    %c0_i32 = arith.constant 0 : i32
    %c0_i32_0 = arith.constant 0 : i32
    %c0_i32_1 = arith.constant 0 : i32
    return %arg0, %c0_i32, %c0_i32_0 : i32, i32, i32
  }
}

</mosaic_0001>

<bundles_post_ra>
// kernel: tpu_custom_call.1
= control target key start
LH: loop header
LB: loop body
LE: loop exit
PB: predicated region body
PF: predicated region fallthrough
CT: control target
= control target key end

     0   :  { %9 = vsyncpa [#allocation4], 0  ;;  %s1027_s0 = inlined_call_operand.hbm [shape: bf16[128,256], index: 0, kind: input, shape index: {}]   ;;  %s1028_s1 = inlined_call_operand.hbm [shape: bf16[256,128], index: 1, kind: input, shape index: {}]   ;;  %s1029_s2 = inlined_call_operand.hbm [shape: bf16[128,128], index: 2, kind: output, shape index: {0}]   ;;  %s1030_s3 = inlined_call_operand.hbm [shape: f32[1,2,128], index: 3, kind: output, shape index: {1}]  }
   0x1   :  { %10 = vsyncpa [#allocation7], 0 }
   0x2   :  { %11 = vsyncpa [#allocation5], 0 }
   0x3   :  { %12 = vsyncpa [#allocation10], 0  ;;  %s951_s12 = smov [#allocation3]  }
   0x4   :  { %s18_s13 = sshll.u32 %s951_s12, 4  ;;  %s19_s13 = int_to_ptr.vmem [resolvable:$true] %s18_s13 }
   0x5   :  { %s871_s14 = scalar_lea.vmem %s19_s13, 2048  ;;  %p876_p1 = scmp.lt.s32.totalorder %s19_s13, %s19_s13 }
   0x6   :  { %p872_p0 = scmp.ne.s32.totalorder %s19_s13, %s871_s14  ;;  %p877_p2 = scmp.lt.s32.totalorder %s871_s14, %s871_s14 }
   0x8   :  { %p878_p3 = por %p877_p2, %p876_p1 }
   0xa   :  { %p879_p4 = pnand %p878_p3, %p872_p0 }
   0xc   :  { %882 = shalt.err (!%p879_p4)
}
   0xd   :  { %s952_s15 = smov 128   ;;  %s953_s16 = smov 8  }
   0xe   :  { %24 = dma.hbm_to_vmem [thread:$0]  %s1027_s0, 2048, %s19_s13, [#allocation4], %s952_s15, %s952_s15, %s953_s16  }
   0xf   :  { %s954_s19 = smov [#allocation6]  }
  0x10   :  { %s30_s20 = sshll.u32 %s954_s19, 4  ;;  %s31_s20 = int_to_ptr.vmem [resolvable:$true] %s30_s20 }
  0x11   :  { %s891_s21 = scalar_lea.vmem %s31_s20, 2048  ;;  %p896_p6 = scmp.lt.s32.totalorder %s31_s20, %s31_s20 }
  0x12   :  { %p892_p5 = scmp.ne.s32.totalorder %s31_s20, %s891_s21  ;;  %p897_p7 = scmp.lt.s32.totalorder %s891_s21, %s891_s21 }
  0x14   :  { %p898_p8 = por %p897_p7, %p896_p6 }
  0x16   :  { %p899_p9 = pnand %p898_p8, %p892_p5 }
  0x18   :  { %902 = shalt.err (!%p899_p9)
}
  0x19   :  { %s955_s22 = smov 64   ;;  %s956_s23 = smov 4  }
  0x1a   :  { %36 = dma.hbm_to_vmem [thread:$0]  %s1028_s1, 2048, %s31_s20, [#allocation7], %s955_s22, %s955_s22, %s956_s23  }
  0x1b   :  { %943 = dma.done.wait [#allocation4], 2048  }
  0x1c   :  { %944 = vsyncadd [#allocation4], 4294965248 }
  0x1d   :  { %945 = dma.done.wait [#allocation7], 2048  }
  0x1e   :  { %946 = vsyncadd [#allocation7], 4294965248  ;;  %v823_v0 = vld [vmem:[#allocation6 + $0x78] sm:$0xff]   ;;  %v825_v2 = vld [vmem:[#allocation6 + $0x70] sm:$0xff]   ;;  %s957_s0 = smov [#allocation8]  }
  0x1f   :  { %v824_v1 = vld [vmem:[#allocation6 + $0x38] sm:$0xff]   ;;  %735 = vmatprep.subr.bf16.mxu0 %v823_v0  ;;  %799 = vmatprep.subr.bf16.mxu1 %v823_v0  ;;  %v826_v3 = vld [vmem:[#allocation6 + $0x30] sm:$0xff]   ;;  %v827_v4 = vld [vmem:[#allocation6 + $0x68] sm:$0xff]   ;;  %s597_s1 = sshll.u32 %s957_s0, 4  ;;  %s598_s1 = int_to_ptr.vmem [resolvable:$true] %s597_s1 }
  0x20   :  { %736 = vmatpush3.bf16.msra.mxu0 %v824_v1  ;;  %807 = vmatpush3.bf16.msra.mxu1 %v824_v1  ;;  %v828_v5 = vld [vmem:[#allocation6 + $0x28] sm:$0xff]   ;;  %v829_v6 = vld [vmem:[#allocation6 + $0x60] sm:$0xff]   ;;  %v831_v8 = vld [vmem:[#allocation6 + $0x58] sm:$0xff]   ;;  %s903_s26 = scalar_lea.vmem %s598_s1, 1024  ;;  %p908_p11 = scmp.lt.s32.totalorder %s598_s1, %s598_s1 }
  0x21   :  { %737 = vmatprep.subr.bf16.mxu0 %v825_v2  ;;  %800 = vmatprep.subr.bf16.mxu1 %v825_v2  ;;  %v830_v7 = vld [vmem:[#allocation6 + $0x20] sm:$0xff]   ;;  %v832_v9 = vld [vmem:[#allocation6 + $0x18] sm:$0xff]   ;;  %v833_v10 = vld [vmem:[#allocation6 + $0x50] sm:$0xff]   ;;  %p904_p10 = scmp.ne.s32.totalorder %s598_s1, %s903_s26  ;;  %p909_p12 = scmp.lt.s32.totalorder %s903_s26, %s903_s26 }
  0x22   :  { %v841_v11 = vld [vmem:[#allocation3 + $0x4] ss:$8 sps:$4 sm:$0xff]   ;;  %v834_v12 = vld [vmem:[#allocation6 + $0x10] sm:$0xff]   ;;  %v839_v18 = vld [vmem:[#allocation3] ss:$8 sps:$4 sm:$0xff]  }
  0x23   :  { %v847_v13 = vld [vmem:[#allocation3 + $0x44] ss:$8 sps:$4 sm:$0xff]   ;;  %336 = vmatprep.mubr.bf16.mxu0 %v841_v11  ;;  %v845_v19 = vld [vmem:[#allocation3 + $0x40] ss:$8 sps:$4 sm:$0xff]   ;;  %v842_v20 = vld [vmem:[#allocation3 + $0x14] ss:$8 sps:$4 sm:$0xff]   ;;  %p910_p13 = por %p909_p12, %p908_p11 }
  0x24   :  { %738 = vmatpush3.bf16.msra.mxu0 %v826_v3  ;;  %808 = vmatpush3.bf16.msra.mxu1 %v826_v3  ;;  %v835_v14 = vld [vmem:[#allocation6 + $0x48] sm:$0xff]   ;;  %v837_v16 = vld [vmem:[#allocation6 + $0x40] sm:$0xff]   ;;  %v851_v21 = vld [vmem:[#allocation3 + $0x54] ss:$8 sps:$4 sm:$0xff]  }
  0x25   :  { %739 = vmatprep.subr.bf16.mxu0 %v827_v4  ;;  %801 = vmatprep.subr.bf16.mxu1 %v827_v4  ;;  %v836_v15 = vld [vmem:[#allocation6 + $0x8] sm:$0xff]   ;;  %v838_v17 = vld [vmem:[#allocation6] sm:$0xff]   ;;  %v844_v22 = vld [vmem:[#allocation3 + $0x10] ss:$8 sps:$4 sm:$0xff]   ;;  %p911_p0 = pnand %p910_p13, %p904_p10 }
  0x26   :  { %368 = vmatprep.mubr.bf16.mxu1 %v847_v13  ;;  %v853_v23 = vld [vmem:[#allocation3 + $0x50] ss:$8 sps:$4 sm:$0xff]   ;;  %v848_v24 = vld [vmem:[#allocation3 + $0x24] ss:$8 sps:$4 sm:$0xff]   ;;  %v850_v26 = vld [vmem:[#allocation3 + $0x20] ss:$8 sps:$4 sm:$0xff]  }
  0x27   :  { %v857_v25 = vld [vmem:[#allocation3 + $0x64] ss:$8 sps:$4 sm:$0xff]   ;;  %v859_v27 = vld [vmem:[#allocation3 + $0x60] ss:$8 sps:$4 sm:$0xff]   ;;  %v854_v28 = vld [vmem:[#allocation3 + $0x34] ss:$8 sps:$4 sm:$0xff]  }
  0x28   :  { %740 = vmatpush3.bf16.msra.mxu0 %v828_v5  ;;  %809 = vmatpush3.bf16.msra.mxu1 %v828_v5  ;;  %v860_v29 = vld [vmem:[#allocation3 + $0x74] ss:$8 sps:$4 sm:$0xff]   ;;  %v856_v30 = vld [vmem:[#allocation3 + $0x30] ss:$8 sps:$4 sm:$0xff]  }
  0x29   :  { %741 = vmatprep.subr.bf16.mxu0 %v829_v6  ;;  %802 = vmatprep.subr.bf16.mxu1 %v829_v6  ;;  %v862_v31 = vld [vmem:[#allocation3 + $0x70] ss:$8 sps:$4 sm:$0xff]  }
  0x2c   :  { %742 = vmatpush3.bf16.msra.mxu0 %v830_v7  ;;  %810 = vmatpush3.bf16.msra.mxu1 %v830_v7 }
  0x2d   :  { %743 = vmatprep.subr.bf16.mxu0 %v831_v8  ;;  %803 = vmatprep.subr.bf16.mxu1 %v831_v8 }
  0x30   :  { %744 = vmatpush3.bf16.msra.mxu0 %v832_v9  ;;  %811 = vmatpush3.bf16.msra.mxu1 %v832_v9 }
  0x31   :  { %745 = vmatprep.subr.bf16.mxu0 %v833_v10  ;;  %804 = vmatprep.subr.bf16.mxu1 %v833_v10 }
  0x34   :  { %746 = vmatpush3.bf16.msra.mxu0 %v834_v12  ;;  %812 = vmatpush3.bf16.msra.mxu1 %v834_v12 }
  0x35   :  { %747 = vmatprep.subr.bf16.mxu0 %v835_v14  ;;  %805 = vmatprep.subr.bf16.mxu1 %v835_v14 }
  0x38   :  { %748 = vmatpush3.bf16.msra.mxu0 %v836_v15  ;;  %813 = vmatpush3.bf16.msra.mxu1 %v836_v15 }
  0x39   :  { %749 = vmatprep.subr.bf16.mxu0 %v837_v16  ;;  %806 = vmatprep.subr.bf16.mxu1 %v837_v16 }
  0x3c   :  { %750 = vmatpush3.bf16.msra.mxu0 %v838_v17  ;;  %814 = vmatpush3.bf16.msra.mxu1 %v838_v17 }
  0x3f   :  { %337 = vmatmul.mubr.bf16.vlgmr.msra.gmra.mxu0 %v839_v18  ;;  %369 = vmatmul.mubr.bf16.vlgmr.msra.gmra.mxu1 %v845_v19 }
  0x40   :  { %344 = vmatprep.mubr.bf16.mxu0 %v842_v20  ;;  %376 = vmatprep.mubr.bf16.mxu1 %v851_v21 }
  0x47   :  { %345 = vmatmul.mubr.bf16.gmra.mxu0 %v844_v22  ;;  %377 = vmatmul.mubr.bf16.gmra.mxu1 %v853_v23 }
  0x48   :  { %352 = vmatprep.mubr.bf16.mxu0 %v848_v24  ;;  %384 = vmatprep.mubr.bf16.mxu1 %v857_v25 }
  0x4f   :  { %353 = vmatmul.mubr.bf16.gmra.mxu0 %v850_v26  ;;  %385 = vmatmul.mubr.bf16.gmra.mxu1 %v859_v27 }
  0x50   :  { %360 = vmatprep.mubr.bf16.mxu0 %v854_v28  ;;  %392 = vmatprep.mubr.bf16.mxu1 %v860_v29 }
  0x57   :  { %361 = vmatmul.mubr.bf16.gmra.mxu0 %v856_v30  ;;  %393 = vmatmul.mubr.bf16.gmra.mxu1 %v862_v31 }
  0xff   :  { %v751_v32 = vpop.f32.mrf.mxu0  ;;  %v775_v33 = vpop.f32.mrf.mxu1 }
 0x101   :  { %v752_v34 = vpop.f32.mrf.mxu0  ;;  %v776_v35 = vpop.f32.mrf.mxu1 }
 0x102   :  { %v988_v38 = vadd.f32 %v776_v35, %v775_v33  ;;  %v753_v41 = vadd.f32 %v752_v34, %v751_v32 }
 0x103   :  { %v754_v36 = vpop.f32.mrf.mxu0  ;;  %v778_v37 = vpop.f32.mrf.mxu1 }
 0x104   :  { %v554_v1 = vmul.f32 %v753_v41, %v753_v41 }
 0x105   :  { %v755_v39 = vpop.f32.mrf.mxu0  ;;  %v779_v40 = vpop.f32.mrf.mxu1 }
 0x106   :  { %v756_v42 = vadd.f32 %v755_v39, %v754_v36  ;;  %v990_v43 = vadd.f32 %v779_v40, %v778_v37 }
 0x107   :  { %v757_v44 = vpop.f32.mrf.mxu0  ;;  %v781_v45 = vpop.f32.mrf.mxu1 }
 0x108   :  { %v691_v46 = vpack.c.bf16 %v756_v42, %v753_v41  ;;  %v711_v47 = vpack.c.bf16 %v990_v43, %v988_v38  ;;  %v555_v62 = vmul.f32 %v756_v42, %v756_v42  ;;  %v532_v6 = vadd.f32 %v756_v42, %v753_v41 }
 0x109   :  { %v758_v48 = vpop.f32.mrf.mxu0  ;;  %v782_v49 = vpop.f32.mrf.mxu1 }
 0x10a   :  { %692 = vst [vmem:[#allocation8] sm:$0xff] %v691_v46   ;;  %731 = vst [vmem:[#allocation8 + $0x20] sm:$0xff] %v711_v47   ;;  %v994_v52 = vadd.f32 %v782_v49, %v781_v45  ;;  %v759_v55 = vadd.f32 %v758_v48, %v757_v44  ;;  %v570_v8 = vadd.f32 %v555_v62, %v554_v1 }
 0x10b   :  { %v760_v50 = vpop.f32.mrf.mxu0  ;;  %v784_v51 = vpop.f32.mrf.mxu1  ;;  %v562_v47 = vmul.f32 %v988_v38, %v988_v38 }
 0x10c   :  { %v556_v2 = vmul.f32 %v759_v55, %v759_v55  ;;  %v533_v12 = vadd.f32 %v759_v55, %v532_v6 }
 0x10d   :  { %v761_v53 = vpop.f32.mrf.mxu0  ;;  %v785_v54 = vpop.f32.mrf.mxu1 }
 0x10e   :  { %v762_v56 = vadd.f32 %v761_v53, %v760_v50  ;;  %v996_v57 = vadd.f32 %v785_v54, %v784_v51  ;;  %v571_v15 = vadd.f32 %v570_v8, %v556_v2 }
 0x10f   :  { %v763_v58 = vpop.f32.mrf.mxu0  ;;  %v787_v59 = vpop.f32.mrf.mxu1 }
 0x110   :  { %v696_v60 = vpack.c.bf16 %v762_v56, %v759_v55  ;;  %v716_v61 = vpack.c.bf16 %v996_v57, %v994_v52  ;;  %v557_v9 = vmul.f32 %v762_v56, %v762_v56  ;;  %v534_v19 = vadd.f32 %v762_v56, %v533_v12 }
 0x111   :  { %v764_v63 = vpop.f32.mrf.mxu0  ;;  %v788_v0 = vpop.f32.mrf.mxu1 }
 0x112   :  { %728 = vst [vmem:[#allocation8 + $0x8] sm:$0xff] %v696_v60   ;;  %732 = vst [vmem:[#allocation8 + $0x28] sm:$0xff] %v716_v61   ;;  %v765_v3 = vadd.f32 %v764_v63, %v763_v58  ;;  %v1000_v7 = vadd.f32 %v788_v0, %v787_v59  ;;  %v572_v22 = vadd.f32 %v571_v15, %v557_v9 }
 0x113   :  { %v766_v4 = vpop.f32.mrf.mxu0  ;;  %v790_v5 = vpop.f32.mrf.mxu1 }
 0x114   :  { %v558_v16 = vmul.f32 %v765_v3, %v765_v3  ;;  %v535_v26 = vadd.f32 %v765_v3, %v534_v19 }
 0x115   :  { %v767_v10 = vpop.f32.mrf.mxu0  ;;  %v791_v11 = vpop.f32.mrf.mxu1 }
 0x116   :  { %v768_v13 = vadd.f32 %v767_v10, %v766_v4  ;;  %v792_v14 = vadd.f32 %v791_v11, %v790_v5  ;;  %v573_v28 = vadd.f32 %v572_v22, %v558_v16 }
 0x117   :  { %v769_v17 = vpop.f32.mrf.mxu0  ;;  %v793_v18 = vpop.f32.mrf.mxu1 }
 0x118   :  { %v701_v20 = vpack.c.bf16 %v768_v13, %v765_v3  ;;  %v721_v21 = vpack.c.bf16 %v792_v14, %v1000_v7  ;;  %v559_v23 = vmul.f32 %v768_v13, %v768_v13  ;;  %v536_v31 = vadd.f32 %v768_v13, %v535_v26 }
 0x119   :  { %v770_v24 = vpop.f32.mrf.mxu0  ;;  %v794_v25 = vpop.f32.mrf.mxu1 }
 0x11a   :  { %729 = vst [vmem:[#allocation8 + $0x10] sm:$0xff] %v701_v20   ;;  %v771_v27 = vadd.f32 %v770_v24, %v769_v17  ;;  %733 = vst [vmem:[#allocation8 + $0x30] sm:$0xff] %v721_v21   ;;  %v795_v33 = vadd.f32 %v794_v25, %v793_v18  ;;  %v574_v34 = vadd.f32 %v573_v28, %v559_v23 }
 0x11b   :  { %v772_v29 = vpop.f32.mrf.mxu0  ;;  %v796_v30 = vpop.f32.mrf.mxu1 }
 0x11c   :  { %v560_v32 = vmul.f32 %v771_v27, %v771_v27  ;;  %v537_v37 = vadd.f32 %v771_v27, %v536_v31 }
 0x11d   :  { %v773_v35 = vpop.f32.mrf.mxu0  ;;  %v797_v36 = vpop.f32.mrf.mxu1 }
 0x11e   :  { %v774_v39 = vadd.f32 %v773_v35, %v772_v29  ;;  %v798_v40 = vadd.f32 %v797_v36, %v796_v30  ;;  %v575_v41 = vadd.f32 %v574_v34, %v560_v32 }
 0x120   :  { %v706_v42 = vpack.c.bf16 %v774_v39, %v771_v27  ;;  %v538_v44 = vadd.f32 %v774_v39, %v537_v37  ;;  %v561_v45 = vmul.f32 %v774_v39, %v774_v39  ;;  %v726_v46 = vpack.c.bf16 %v798_v40, %v795_v33 }
 0x122   :  { %730 = vst [vmem:[#allocation8 + $0x18] sm:$0xff] %v706_v42   ;;  %v539_v48 = vadd.f32 %v988_v38, %v538_v44  ;;  %v576_v49 = vadd.f32 %v575_v41, %v561_v45  ;;  %734 = vst [vmem:[#allocation8 + $0x38] sm:$0xff] %v726_v46  }
 0x123   :  { %914 = shalt.err (!%p911_p0)
}
 0x124   :  { %603 = dma.vmem_to_hbm [thread:$0]  %s598_s1, 1024, %s1029_s2, [#allocation5], %s955_s22, %s955_s22, %s956_s23   ;;  %v563_v50 = vmul.f32 %v990_v43, %v990_v43  ;;  %v540_v38 = vadd.f32 %v990_v43, %v539_v48  ;;  %v577_v51 = vadd.f32 %v576_v49, %v562_v47  ;;  %v564_v53 = vmul.f32 %v994_v52, %v994_v52 }
 0x125   :  { %v565_v56 = vmul.f32 %v996_v57, %v996_v57  ;;  %v566_v60 = vmul.f32 %v1000_v7, %v1000_v7  ;;  %v567_v63 = vmul.f32 %v792_v14, %v792_v14  ;;  %v568_v3 = vmul.f32 %v795_v33, %v795_v33  ;;  %s958_s2 = smov [#allocation9]  }
 0x126   :  { %v578_v54 = vadd.f32 %v577_v51, %v563_v50  ;;  %v541_v55 = vadd.f32 %v994_v52, %v540_v38  ;;  %v569_v5 = vmul.f32 %v798_v40, %v798_v40  ;;  %s610_s29 = sshll.u32 %s958_s2, 4  ;;  %s611_s29 = int_to_ptr.vmem [resolvable:$true] %s610_s29 }
 0x127   :  { %s923_s30 = scalar_lea.vmem %s611_s29, 32  ;;  %p928_p2 = scmp.lt.s32.totalorder %s611_s29, %s611_s29 }
 0x128   :  { %v542_v58 = vadd.f32 %v996_v57, %v541_v55  ;;  %v579_v59 = vadd.f32 %v578_v54, %v564_v53  ;;  %p924_p1 = scmp.ne.s32.totalorder %s611_s29, %s923_s30  ;;  %p929_p3 = scmp.lt.s32.totalorder %s923_s30, %s923_s30 }
 0x12a   :  { %v543_v61 = vadd.f32 %v1000_v7, %v542_v58  ;;  %v580_v62 = vadd.f32 %v579_v59, %v565_v56  ;;  %p930_p4 = por %p929_p3, %p928_p2 }
 0x12c   :  { %v544_v43 = vadd.f32 %v792_v14, %v543_v61  ;;  %v581_v0 = vadd.f32 %v580_v62, %v566_v60  ;;  %p931_p5 = pnand %p930_p4, %p924_p1 }
 0x12e   :  { %v582_v1 = vadd.f32 %v581_v0, %v567_v63  ;;  %v545_v2 = vadd.f32 %v795_v33, %v544_v43 }
 0x130   :  { %v583_v4 = vadd.f32 %v582_v1, %v568_v3  ;;  %v546_v52 = vadd.f32 %v798_v40, %v545_v2 }
 0x132   :  { %v547_v6 = vrot.slane %v546_v52, 4  ;;  %v584_v8 = vadd.f32 %v583_v4, %v569_v5 }
 0x134   :  { %v548_v9 = vadd.f32 %v547_v6, %v546_v52  ;;  %v585_v57 = vrot.slane %v584_v8, 4 }
 0x136   :  { %v549_v10 = vrot.slane %v548_v9, 2  ;;  %v586_v11 = vadd.f32 %v585_v57, %v584_v8 }
 0x138   :  { %v550_v12 = vadd.f32 %v549_v10, %v548_v9  ;;  %v587_v13 = vrot.slane %v586_v11, 2 }
 0x13a   :  { %v551_v15 = vrot.slane %v550_v12, 1  ;;  %v588_v7 = vadd.f32 %v587_v13, %v586_v11 }
 0x13c   :  { %v552_v14 = vadd.f32 %v551_v15, %v550_v12  ;;  %v589_v16 = vrot.slane %v588_v7, 1 }
 0x13e   :  { %553 = vst [vmem:[#allocation9] sm:$0x1] %v552_v14  ;;  %v590_v17 = vadd.f32 %v589_v16, %v588_v7 }
 0x140   :  { %591 = vst [vmem:[#allocation9 + $0x1] sm:$0x1] %v590_v17 }
 0x141   :  { %934 = shalt.err (!%p931_p5)
}
 0x142   :  { %613 = dma.vmem_to_hbm [thread:$0]  %s611_s29, 32, %s1030_s3, [#allocation10]  }
 0x143   :  { %947 = dma.done.wait [#allocation5], 1024  }
 0x144   :  { %948 = vsyncadd [#allocation5], 4294966272 }
 0x145   :  { %949 = dma.done.wait [#allocation10], 32  }
 0x146   :  { %950 = vsyncadd [#allocation10], 4294967264 }
 0x147   :  { %620 = vsyncpa [#allocation4], 1 }
 0x148   :  { %621 = vsyncpa [#allocation7], 1 }
 0x149   :  { %622 = vsyncpa [#allocation5], 1 }
 0x14a   :  { %623 = vsyncpa [#allocation10], 1 }

</bundles_post_ra>
